<compile_context>
chip_gen: v7x
topology: tpu7x:2x2x1
jax: 0.10.0
libtpu: 0.0.40
codegen_flags: <defaults>
</compile_context>

<pallas_src>
import functools

import jax
import jax.numpy as jnp
from jax.experimental import pallas as pl
from jax.experimental.pallas import tpu as pltpu


def _round_up(n, m):
    return ((n + m - 1) // m) * m


def _cdiv(a, b):
    return (a + b - 1) // b


def mlp_kernel(x_ref, w1_ref, b1_ref, w2_ref, b2_ref, o_ref, *, use_bf16):
    x = x_ref[...]
    w1 = w1_ref[...]
    w2 = w2_ref[...]
    if use_bf16:
        # bf16 MXU operands (3-4x MXU rate on v6e/v7x, ~2-3x on v5e);
        # accumulation and the bias/ReLU epilogue remain f32.
        x = x.astype(jnp.bfloat16)
        w1 = w1.astype(jnp.bfloat16)
        w2 = w2.astype(jnp.bfloat16)
    # hidden = relu(x @ w1 + b1)   -- MXU matmul (f32 accumulate), VPU epilogue
    h = jnp.dot(x, w1, preferred_element_type=jnp.float32)
    h = jnp.maximum(h + b1_ref[...], 0.0)            # (TB, 256) + (1, 256)
    if use_bf16:
        h = h.astype(jnp.bfloat16)
    # out = hidden @ w2 + b2       -- w2/b2 zero-padded to a 128-lane output
    out = jnp.dot(h, w2, preferred_element_type=jnp.float32)
    o_ref[...] = (out + b2_ref[...]).astype(o_ref.dtype)


@functools.partial(jax.jit, static_argnames=("block_b", "use_bf16"))
def mlp_forward(x, w1, b1, w2, b2, *, block_b=2048, use_bf16=False):
    """x: [B, 784]; w1: [784, 256]; b1: [1, 256]; w2: [256, 10]; b2: [1, 10]."""
    B, in_dim = x.shape
    hid = w1.shape[1]
    out_dim = w2.shape[1]
    # w1's N / b1 are never padded, so the hidden width must be lane-aligned.
    assert hid % 128 == 0, "hidden width must be a multiple of 128"

    # Output lanes padded (10 -> 128) so the final store is unmasked / lane-dense.
    out_p = _round_up(max(out_dim, 128), 128)

    # Batch tiling: even tiles (avoids ~2x pad waste for awkward B) and >= 2
    # grid steps whenever B allows so the "parallel" axis splits across both
    # v7x TensorCores.  Tile rows are a multiple of 8 (sublanes).
    b8 = _round_up(B, 8)
    num_tiles = max(2, _cdiv(b8, block_b)) if b8 >= 16 else 1
    tb = _round_up(_cdiv(b8, num_tiles), 8)
    b_p = _round_up(b8, tb)
    grid = (b_p // tb,)

    # Only pad the batch axis (no K pad of x -> no extra HBM pass over x).
    x_p = jnp.pad(x, ((0, b_p - B), (0, 0))) if b_p != B else x
    w2_p = jnp.pad(w2, ((0, 0), (0, out_p - out_dim)))
    b2_p = jnp.pad(b2, ((0, 0), (0, out_p - out_dim)))

    itemsize = jnp.dtype(x.dtype).itemsize
    flops = 2 * b_p * (in_dim * hid + hid * out_p)
    bytes_accessed = itemsize * (b_p * in_dim + in_dim * hid + hid
                                 + hid * out_p + out_p + b_p * out_p)

    # VMEM budget from the actual buffers (double-buffered x/out tiles,
    # resident params, h intermediate) + headroom; stays well under the
    # 64 MiB/TC limit of v7x even at tb=2048 (~30 MiB total).
    vmem_bytes = 4 * (2 * tb * in_dim            # x tile, double-buffered
                      + 2 * tb * out_p           # out tile, double-buffered
                      + 2 * (in_dim * hid + hid + hid * out_p + out_p)  # params
                      + 2 * tb * hid)            # hidden intermediate + slack
    vmem_limit = min(vmem_bytes + (8 << 20), 96 << 20)

    # TODO(synk): mark the constant-index_map weight/bias specs
    # pipeline_mode=pl.Buffered(1) once single-buffering of resident inputs is
    # verified to compile; irrelevant at this model size.
    out = pl.pallas_call(
        functools.partial(mlp_kernel, use_bf16=use_bf16),
        out_shape=jax.ShapeDtypeStruct((b_p, out_p), x.dtype),
        grid_spec=pltpu.PrefetchScalarGridSpec(
            num_scalar_prefetch=0,
            grid=grid,
            in_specs=[
                pl.BlockSpec((tb, in_dim), lambda i: (i, 0)),    # x: per-tile, full-K
                pl.BlockSpec((in_dim, hid), lambda i: (0, 0)),   # w1: VMEM-resident
                pl.BlockSpec((1, hid), lambda i: (0, 0)),        # b1: VMEM-resident
                pl.BlockSpec((hid, out_p), lambda i: (0, 0)),    # w2: VMEM-resident
                pl.BlockSpec((1, out_p), lambda i: (0, 0)),      # b2: VMEM-resident
            ],
            out_specs=pl.BlockSpec((tb, out_p), lambda i: (i, 0)),
        ),
        compiler_params=pltpu.CompilerParams(
            dimension_semantics=("parallel",),
            vmem_limit_bytes=vmem_limit,
        ),
        cost_estimate=pl.CostEstimate(
            flops=flops, transcendentals=0, bytes_accessed=bytes_accessed),
    )(x_p, w1, b1, w2_p, b2_p)

    # Slice away batch and output-lane padding.
    return out[:B, :out_dim]


if __name__ == "__main__":
    key = jax.random.PRNGKey(0)
    k_x, k_w1, k_b1, k_w2, k_b2 = jax.random.split(key, 5)

    B, IN, HID, OUT = 8, 784, 256, 10

    x = jax.random.normal(k_x, (B, IN), dtype=jnp.float32)
    # Parameters stored transposed vs. PyTorch nn.Linear ((out,in) -> (in,out)),
    # so the kernel computes x @ w + b.
    w1 = jax.random.normal(k_w1, (IN, HID), dtype=jnp.float32) * 0.02
    b1 = jax.random.normal(k_b1, (1, HID), dtype=jnp.float32) * 0.02
    w2 = jax.random.normal(k_w2, (HID, OUT), dtype=jnp.float32) * 0.02
    b2 = jax.random.normal(k_b2, (1, OUT), dtype=jnp.float32) * 0.02

    out = mlp_forward(x, w1, b1, w2, b2)
    out = jax.block_until_ready(out)

    # Pure-JAX reference check of the fused kernel (f32 path -> tight tolerance).
    ref = jnp.maximum(x @ w1 + b1, 0.0) @ w2 + b2
    assert out.shape == (B, OUT)
    assert jnp.allclose(out, ref, atol=1e-5, rtol=1e-5), float(
        jnp.max(jnp.abs(out - ref)))

    # bf16 MXU path (perf option for v5e/v6e/v7x) -- looser tolerance.
    out_bf16 = jax.block_until_ready(mlp_forward(x, w1, b1, w2, b2, use_bf16=True))
    assert jnp.allclose(out_bf16, ref, atol=3e-2, rtol=3e-2), float(
        jnp.max(jnp.abs(out_bf16 - ref)))

    print("KERNEL_OK")
</pallas_src>

<mosaic_0001>
module attributes {stable_mosaic.version = 11 : i64} {
  func.func @mlp_kernel(%arg0: i32, %arg1: memref<8x784xf32, #tpu.memory_space<vmem>>, %arg2: memref<784x256xf32, #tpu.memory_space<vmem>>, %arg3: memref<1x256xf32, #tpu.memory_space<vmem>>, %arg4: memref<256x128xf32, #tpu.memory_space<vmem>>, %arg5: memref<1x128xf32, #tpu.memory_space<vmem>>, %arg6: memref<8x128xf32, #tpu.memory_space<vmem>>) attributes {dimension_semantics = [#tpu.dimension_semantics<parallel>], iteration_bounds = array<i64: 1>, scalar_prefetch = 0 : i64, scratch_operands = 0 : i64, tpu.core_type = #tpu.core_type<tc>, window_params = [{transform_indices = @transform_0, window_bounds = array<i64: 8, 784>}, {pipeline_mode = #tpu.pipeline_mode<synchronous>, transform_indices = @transform_1, window_bounds = array<i64: 784, 256>}, {pipeline_mode = #tpu.pipeline_mode<synchronous>, transform_indices = @transform_2, window_bounds = array<i64: 1, 256>}, {pipeline_mode = #tpu.pipeline_mode<synchronous>, transform_indices = @transform_3, window_bounds = array<i64: 256, 128>}, {pipeline_mode = #tpu.pipeline_mode<synchronous>, transform_indices = @transform_4, window_bounds = array<i64: 1, 128>}, {transform_indices = @transform_5, window_bounds = array<i64: 8, 128>}]} {
    %c0 = arith.constant 0 : index
    %c0_0 = arith.constant 0 : index
    %0 = vector.load %arg1[%c0, %c0_0] : memref<8x784xf32, #tpu.memory_space<vmem>>, vector<8x784xf32>
    %c0_1 = arith.constant 0 : index
    %c0_2 = arith.constant 0 : index
    %1 = vector.load %arg2[%c0_1, %c0_2] : memref<784x256xf32, #tpu.memory_space<vmem>>, vector<784x256xf32>
    %c0_3 = arith.constant 0 : index
    %c0_4 = arith.constant 0 : index
    %2 = vector.load %arg4[%c0_3, %c0_4] : memref<256x128xf32, #tpu.memory_space<vmem>>, vector<256x128xf32>
    %cst = arith.constant dense<0.000000e+00> : vector<8x256xf32>
    %3 = tpu.matmul %0, %1, %cst {dimension_numbers = #tpu.dot_dimension_numbers<[1], [0], [0], [1], [0, 0, 1, 1], [], []>} : vector<8x784xf32>, vector<784x256xf32>, vector<8x256xf32> -> vector<8x256xf32>
    %c0_5 = arith.constant 0 : index
    %c0_6 = arith.constant 0 : index
    %4 = vector.load %arg3[%c0_5, %c0_6] : memref<1x256xf32, #tpu.memory_space<vmem>>, vector<1x256xf32>
    %5 = vector.broadcast %4 : vector<1x256xf32> to vector<8x256xf32>
    %6 = arith.addf %3, %5 : vector<8x256xf32>
    %cst_7 = arith.constant 0.000000e+00 : f32
    %7 = vector.broadcast %cst_7 : f32 to vector<8x256xf32>
    %8 = arith.maximumf %6, %7 : vector<8x256xf32>
    %cst_8 = arith.constant dense<0.000000e+00> : vector<8x128xf32>
    %9 = tpu.matmul %8, %2, %cst_8 {dimension_numbers = #tpu.dot_dimension_numbers<[1], [0], [0], [1], [0, 0, 1, 1], [], []>} : vector<8x256xf32>, vector<256x128xf32>, vector<8x128xf32> -> vector<8x128xf32>
    %c0_9 = arith.constant 0 : index
    %c0_10 = arith.constant 0 : index
    %10 = vector.load %arg5[%c0_9, %c0_10] : memref<1x128xf32, #tpu.memory_space<vmem>>, vector<1x128xf32>
    %11 = vector.broadcast %10 : vector<1x128xf32> to vector<8x128xf32>
    %12 = arith.addf %9, %11 : vector<8x128xf32>
    %c0_11 = arith.constant 0 : index
    %c0_12 = arith.constant 0 : index
    %13 = vector.load %arg6[%c0_11, %c0_12] : memref<8x128xf32, #tpu.memory_space<vmem>>, vector<8x128xf32>
    tpu.vector_store %arg6[%c0_11, %c0_12], %12 {strides = array<i32>} : memref<8x128xf32, #tpu.memory_space<vmem>>, vector<8x128xf32>,
    return
  }
  func.func @transform_0(%arg0: i32) -> (i32, i32) {
    %c0_i32 = arith.constant 0 : i32
    %c0_i32_0 = arith.constant 0 : i32
    return %arg0, %c0_i32 : i32, i32
  }
  func.func @transform_1(%arg0: i32) -> (i32, i32) {
    %c0_i32 = arith.constant 0 : i32
    %c0_i32_0 = arith.constant 0 : i32
    %c0_i32_1 = arith.constant 0 : i32
    return %c0_i32, %c0_i32_0 : i32, i32
  }
  func.func @transform_2(%arg0: i32) -> (i32, i32) {
    %c0_i32 = arith.constant 0 : i32
    %c0_i32_0 = arith.constant 0 : i32
    %c0_i32_1 = arith.constant 0 : i32
    return %c0_i32, %c0_i32_0 : i32, i32
  }
  func.func @transform_3(%arg0: i32) -> (i32, i32) {
    %c0_i32 = arith.constant 0 : i32
    %c0_i32_0 = arith.constant 0 : i32
    %c0_i32_1 = arith.constant 0 : i32
    return %c0_i32, %c0_i32_0 : i32, i32
  }
  func.func @transform_4(%arg0: i32) -> (i32, i32) {
    %c0_i32 = arith.constant 0 : i32
    %c0_i32_0 = arith.constant 0 : i32
    %c0_i32_1 = arith.constant 0 : i32
    return %c0_i32, %c0_i32_0 : i32, i32
  }
  func.func @transform_5(%arg0: i32) -> (i32, i32) {
    %c0_i32 = arith.constant 0 : i32
    %c0_i32_0 = arith.constant 0 : i32
    return %arg0, %c0_i32 : i32, i32
  }
}

</mosaic_0001>

<bundles_post_ra>
// kernel: mlp_forward.1
= control target key start
LH: loop header
LB: loop body
LE: loop exit
PB: predicated region body
PF: predicated region fallthrough
CT: control target
= control target key end

     0   :  { %10 = vsyncpa [#allocation3], 0  ;;  %s1173_s0 = inlined_call_operand.vmem [shape: f32[8,784], index: 0, kind: input, shape index: {}]   ;;  %s1174_s1 = inlined_call_operand.hbm [shape: f32[784,256], index: 1, kind: input, shape index: {}]   ;;  %s1175_s2 = inlined_call_operand.vmem [shape: f32[1,256], index: 2, kind: input, shape index: {}]   ;;  %s1176_s3 = inlined_call_operand.vmem [shape: f32[256,128], index: 3, kind: input, shape index: {}]   ;;  %s1177_s4 = inlined_call_operand.vmem [shape: f32[1,128], index: 4, kind: input, shape index: {}]   ;;  %s1178_s5 = inlined_call_operand.hbm [shape: f32[8,128], index: 5, kind: output, shape index: {}]  }
   0x1   :  { %11 = vsyncpa [#allocation4], 0  ;;  %s991_s18 = smov [#allocation2]   ;;  %s943_s22 = scalar_lea.hbm %s1174_s1, 25088 }
   0x2   :  { %s19_s19 = sshll.u32 %s991_s18, 4  ;;  %p944_p0 = scmp.ne.s32.totalorder %s1174_s1, %s943_s22  ;;  %s20_s19 = int_to_ptr.vmem [resolvable:$true] %s19_s19 }
   0x3   :  { %p947_p1 = scmp.lt.u32.totalorder %s943_s22, %s1174_s1 }
   0x5   :  { %p949_p2 = pnand %p947_p1, %p944_p0 }
   0x7   :  { %952 = shalt.err (!%p949_p2)
}
   0x8   :  { %s953_s27 = scalar_lea.vmem %s20_s19, 25088  ;;  %p958_p4 = scmp.lt.s32.totalorder %s20_s19, %s20_s19 }
   0x9   :  { %p954_p3 = scmp.ne.s32.totalorder %s20_s19, %s953_s27  ;;  %p959_p5 = scmp.lt.s32.totalorder %s953_s27, %s953_s27 }
   0xb   :  { %p960_p6 = por %p959_p5, %p958_p4 }
   0xd   :  { %p961_p7 = pnand %p960_p6, %p954_p3 }
   0xf   :  { %964 = shalt.err (!%p961_p7)
}
  0x10   :  { %s992_s28 = smov 256   ;;  %s993_s29 = smov 16  }
  0x11   :  { %25 = dma.hbm_to_vmem [thread:$0]  %s1174_s1, 25088, %s20_s19, [#allocation3], %s992_s28, %s992_s28, %s993_s29  }
  0x12   :  { %987 = dma.done.wait [#allocation3], 25088  }
  0x13   :  { %988 = vsyncadd [#allocation3], 4294942208  ;;  %v107_v0 = vld [vmem:[#allocation2 + $0x208] sm:$0xff]  ;;  %v109_v1 = vld [vmem:[#allocation2 + $0x218] sm:$0xff]  ;;  %vm282_vm0 = vcmask 130048  }
  0x14   :  { %v106_v2 = vld [vmem:[#allocation2 + $0x200] sm:$0xff]  ;;  %v766_v3 = vpack.c.bf16 %v109_v1, %v107_v0  ;;  %v108_v4 = vld [vmem:[#allocation2 + $0x210] sm:$0xff]  ;;  %v111_v5 = vld [vmem:[#allocation2 + $0x228] sm:$0xff] }
  0x15   :  { %v113_v6 = vld [vmem:[#allocation2 + $0x238] sm:$0xff]  ;;  %v768_v7 = vpack.c.bf16 %v108_v4, %v106_v2  ;;  %v110_v9 = vld [vmem:[#allocation2 + $0x220] sm:$0xff]  ;;  %v112_v10 = vld [vmem:[#allocation2 + $0x230] sm:$0xff] }
  0x16   :  { %v770_v8 = vpack.c.bf16 %v113_v6, %v111_v5  ;;  %v115_v11 = vld [vmem:[#allocation2 + $0x248] sm:$0xff]  ;;  %767 = vmatprep.subr.bf16.mxu0 %v766_v3  ;;  %v117_v12 = vld [vmem:[#allocation2 + $0x258] sm:$0xff]  ;;  %v772_v13 = vpack.c.bf16 %v112_v10, %v110_v9  ;;  %v114_v15 = vld [vmem:[#allocation2 + $0x240] sm:$0xff] }
  0x17   :  { %769 = vmatpush1.bf16.msra.mxu0 %v768_v7  ;;  %v774_v14 = vpack.c.bf16 %v117_v12, %v115_v11  ;;  %v116_v16 = vld [vmem:[#allocation2 + $0x250] sm:$0xff]  ;;  %v119_v17 = vld [vmem:[#allocation2 + $0x268] sm:$0xff]  ;;  %v121_v18 = vld [vmem:[#allocation2 + $0x278] sm:$0xff] }
  0x18   :  { %771 = vmatprep.subr.bf16.mxu0 %v770_v8  ;;  %v776_v19 = vpack.c.bf16 %v116_v16, %v114_v15  ;;  %v778_v20 = vpack.c.bf16 %v121_v18, %v119_v17  ;;  %v118_v21 = vld [vmem:[#allocation2 + $0x260] sm:$0xff]  ;;  %v120_v22 = vld [vmem:[#allocation2 + $0x270] sm:$0xff]  ;;  %v123_v23 = vld [vmem:[#allocation2 + $0x288] sm:$0xff] }
  0x19   :  { %v125_v24 = vld [vmem:[#allocation2 + $0x298] sm:$0xff]  ;;  %v780_v25 = vpack.c.bf16 %v120_v22, %v118_v21  ;;  %v122_v27 = vld [vmem:[#allocation2 + $0x280] sm:$0xff]  ;;  %v124_v28 = vld [vmem:[#allocation2 + $0x290] sm:$0xff] }
  0x1a   :  { %v782_v26 = vpack.c.bf16 %v125_v24, %v123_v23  ;;  %v127_v29 = vld [vmem:[#allocation2 + $0x2a8] sm:$0xff]  ;;  %v129_v30 = vld [vmem:[#allocation2 + $0x2b8] sm:$0xff]  ;;  %v784_v31 = vpack.c.bf16 %v124_v28, %v122_v27  ;;  %v126_v33 = vld [vmem:[#allocation2 + $0x2a0] sm:$0xff] }
  0x1b   :  { %773 = vmatpush1.bf16.msra.mxu0 %v772_v13  ;;  %v786_v32 = vpack.c.bf16 %v129_v30, %v127_v29  ;;  %v128_v34 = vld [vmem:[#allocation2 + $0x2b0] sm:$0xff]  ;;  %v131_v35 = vld [vmem:[#allocation2 + $0x2c8] sm:$0xff]  ;;  %v133_v36 = vld [vmem:[#allocation2 + $0x2d8] sm:$0xff] }
  0x1c   :  { %775 = vmatprep.subr.bf16.mxu0 %v774_v14  ;;  %v788_v37 = vpack.c.bf16 %v128_v34, %v126_v33  ;;  %v130_v38 = vld [vmem:[#allocation2 + $0x2c0] sm:$0xff]  ;;  %v132_v39 = vld [vmem:[#allocation2 + $0x2d0] sm:$0xff]  ;;  %v43_v40 = vld [vmem:[#allocation2 + $0x8] sm:$0xff]  ;;  %v790_v41 = vpack.c.bf16 %v133_v36, %v131_v35 }
  0x1d   :  { %v135_v42 = vld [vmem:[#allocation2 + $0x2e8] sm:$0xff]  ;;  %v137_v43 = vld [vmem:[#allocation2 + $0x2f8] sm:$0xff]  ;;  %v42_v46 = vld [vmem:[#allocation2] sm:$0xff]  ;;  %v792_v51 = vpack.c.bf16 %v132_v39, %v130_v38 }
  0x1e   :  { %v45_v44 = vld [vmem:[#allocation2 + $0x18] sm:$0xff]  ;;  %v44_v47 = vld [vmem:[#allocation2 + $0x10] sm:$0xff]  ;;  %v47_v50 = vld [vmem:[#allocation2 + $0x28] sm:$0xff]  ;;  %v794_v54 = vpack.c.bf16 %v137_v43, %v135_v42 }
  0x1f   :  { %777 = vmatpush1.bf16.msra.mxu0 %v776_v19  ;;  %v702_v45 = vpack.c.bf16 %v45_v44, %v43_v40  ;;  %v38_v48 = vld [vmem:[%s1173_s0 + $0x18] sm:$0xff]  ;;  %v704_v49 = vpack.c.bf16 %v44_v47, %v42_v46  ;;  %v134_v52 = vld [vmem:[#allocation2 + $0x2e0] sm:$0xff]  ;;  %v136_v55 = vld [vmem:[#allocation2 + $0x2f0] sm:$0xff] }
  0x20   :  { %779 = vmatprep.subr.bf16.mxu0 %v778_v20  ;;  %421 = vmatprep.mubr.f32.mxu0 %v38_v48  ;;  %v49_v53 = vld [vmem:[#allocation2 + $0x38] sm:$0xff]  ;;  %v46_v57 = vld [vmem:[#allocation2 + $0x20] sm:$0xff]  ;;  %v48_v58 = vld [vmem:[#allocation2 + $0x30] sm:$0xff]  ;;  %v796_v0 = vpack.c.bf16 %v136_v55, %v134_v52 }
  0x21   :  { %703 = vmatprep.subr.bf16.mxu1 %v702_v45  ;;  %v706_v56 = vpack.c.bf16 %v49_v53, %v47_v50  ;;  %v139_v59 = vld [vmem:[#allocation2 + $0x308] sm:$0xff]  ;;  %v141_v60 = vld [vmem:[#allocation2 + $0x318] sm:$0xff]  ;;  %v708_v61 = vpack.c.bf16 %v48_v58, %v46_v57  ;;  %v138_v1 = vld [vmem:[#allocation2 + $0x300] sm:$0xff] }
  0x22   :  { %705 = vmatpush1.bf16.msra.mxu1 %v704_v49  ;;  %v51_v62 = vld [vmem:[#allocation2 + $0x48] sm:$0xff]  ;;  %v53_v63 = vld [vmem:[#allocation2 + $0x58] sm:$0xff]  ;;  %v50_v3 = vld [vmem:[#allocation2 + $0x40] sm:$0xff]  ;;  %v798_v5 = vpack.c.bf16 %v141_v60, %v139_v59 }
  0x23   :  { %781 = vmatpush1.bf16.msra.mxu0 %v780_v25  ;;  %707 = vmatprep.subr.bf16.mxu1 %v706_v56  ;;  %v710_v2 = vpack.c.bf16 %v53_v63, %v51_v62  ;;  %v52_v4 = vld [vmem:[#allocation2 + $0x50] sm:$0xff]  ;;  %v55_v8 = vld [vmem:[#allocation2 + $0x68] sm:$0xff]  ;;  %v57_v9 = vld [vmem:[#allocation2 + $0x78] sm:$0xff] }
  0x24   :  { %783 = vmatprep.subr.bf16.mxu0 %v782_v26  ;;  %v140_v6 = vld [vmem:[#allocation2 + $0x310] sm:$0xff]  ;;  %v712_v7 = vpack.c.bf16 %v52_v4, %v50_v3  ;;  %v143_v10 = vld [vmem:[#allocation2 + $0x328] sm:$0xff]  ;;  %v145_v11 = vld [vmem:[#allocation2 + $0x338] sm:$0xff]  ;;  %v714_v12 = vpack.c.bf16 %v57_v9, %v55_v8 }
  0x25   :  { %v54_v13 = vld [vmem:[#allocation2 + $0x60] sm:$0xff]  ;;  %v56_v14 = vld [vmem:[#allocation2 + $0x70] sm:$0xff]  ;;  %v800_v15 = vpack.c.bf16 %v140_v6, %v138_v1  ;;  %v59_v16 = vld [vmem:[#allocation2 + $0x88] sm:$0xff]  ;;  %v802_v18 = vpack.c.bf16 %v145_v11, %v143_v10 }
  0x26   :  { %709 = vmatpush1.bf16.msra.mxu1 %v708_v61  ;;  %v61_v17 = vld [vmem:[#allocation2 + $0x98] sm:$0xff]  ;;  %v142_v19 = vld [vmem:[#allocation2 + $0x320] sm:$0xff]  ;;  %v144_v20 = vld [vmem:[#allocation2 + $0x330] sm:$0xff]  ;;  %v716_v22 = vpack.c.bf16 %v56_v14, %v54_v13 }
  0x27   :  { %785 = vmatpush1.bf16.msra.mxu0 %v784_v31  ;;  %711 = vmatprep.subr.bf16.mxu1 %v710_v2  ;;  %v147_v21 = vld [vmem:[#allocation2 + $0x348] sm:$0xff]  ;;  %v149_v23 = vld [vmem:[#allocation2 + $0x358] sm:$0xff]  ;;  %v718_v24 = vpack.c.bf16 %v61_v17, %v59_v16  ;;  %v58_v25 = vld [vmem:[#allocation2 + $0x80] sm:$0xff]  ;;  %v804_v29 = vpack.c.bf16 %v144_v20, %v142_v19 }
  0x28   :  { %787 = vmatprep.subr.bf16.mxu0 %v786_v32  ;;  %v60_v26 = vld [vmem:[#allocation2 + $0x90] sm:$0xff]  ;;  %v63_v27 = vld [vmem:[#allocation2 + $0xa8] sm:$0xff]  ;;  %v65_v28 = vld [vmem:[#allocation2 + $0xb8] sm:$0xff]  ;;  %v806_v30 = vpack.c.bf16 %v149_v23, %v147_v21 }
  0x29   :  { %v146_v31 = vld [vmem:[#allocation2 + $0x340] sm:$0xff]  ;;  %v148_v32 = vld [vmem:[#allocation2 + $0x350] sm:$0xff]  ;;  %v151_v33 = vld [vmem:[#allocation2 + $0x368] sm:$0xff]  ;;  %v720_v34 = vpack.c.bf16 %v60_v26, %v58_v25  ;;  %v722_v36 = vpack.c.bf16 %v65_v28, %v63_v27 }
  0x2a   :  { %713 = vmatpush1.bf16.msra.mxu1 %v712_v7  ;;  %v153_v35 = vld [vmem:[#allocation2 + $0x378] sm:$0xff]  ;;  %v64_v38 = vld [vmem:[#allocation2 + $0xb0] sm:$0xff]  ;;  %v67_v39 = vld [vmem:[#allocation2 + $0xc8] sm:$0xff] }
  0x2b   :  { %789 = vmatpush1.bf16.msra.mxu0 %v788_v37  ;;  %715 = vmatprep.subr.bf16.mxu1 %v714_v12  ;;  %v62_v37 = vld [vmem:[#allocation2 + $0xa0] sm:$0xff]  ;;  %v69_v40 = vld [vmem:[#allocation2 + $0xd8] sm:$0xff]  ;;  %v810_v42 = vpack.c.bf16 %v153_v35, %v151_v33  ;;  %v152_v44 = vld [vmem:[#allocation2 + $0x370] sm:$0xff] }
  0x2c   :  { %791 = vmatprep.subr.bf16.mxu0 %v790_v41  ;;  %v808_v41 = vpack.c.bf16 %v148_v32, %v146_v31  ;;  %v150_v43 = vld [vmem:[#allocation2 + $0x360] sm:$0xff]  ;;  %v155_v45 = vld [vmem:[#allocation2 + $0x388] sm:$0xff]  ;;  %v724_v46 = vpack.c.bf16 %v64_v38, %v62_v37  ;;  %v157_v47 = vld [vmem:[#allocation2 + $0x398] sm:$0xff]  ;;  %v726_v48 = vpack.c.bf16 %v69_v40, %v67_v39 }
  0x2d   :  { %v66_v49 = vld [vmem:[#allocation2 + $0xc0] sm:$0xff]  ;;  %v68_v50 = vld [vmem:[#allocation2 + $0xd0] sm:$0xff]  ;;  %v73_v52 = vld [vmem:[#allocation2 + $0xf8] sm:$0xff]  ;;  %v812_v53 = vpack.c.bf16 %v152_v44, %v150_v43 }
  0x2e   :  { %717 = vmatpush1.bf16.msra.mxu1 %v716_v22  ;;  %v154_v55 = vld [vmem:[#allocation2 + $0x380] sm:$0xff]  ;;  %v156_v56 = vld [vmem:[#allocation2 + $0x390] sm:$0xff]  ;;  %v159_v57 = vld [vmem:[#allocation2 + $0x3a8] sm:$0xff]  ;;  %v728_v58 = vpack.c.bf16 %v68_v50, %v66_v49 }
  0x2f   :  { %793 = vmatpush1.bf16.msra.mxu0 %v792_v51  ;;  %719 = vmatprep.subr.bf16.mxu1 %v718_v24  ;;  %v71_v51 = vld [vmem:[#allocation2 + $0xe8] sm:$0xff]  ;;  %v161_v59 = vld [vmem:[#allocation2 + $0x3b8] sm:$0xff]  ;;  %v70_v61 = vld [vmem:[#allocation2 + $0xe0] sm:$0xff]  ;;  %v816_v1 = vpack.c.bf16 %v156_v56, %v154_v55 }
  0x30   :  { %795 = vmatprep.subr.bf16.mxu0 %v794_v54  ;;  %v814_v54 = vpack.c.bf16 %v157_v47, %v155_v45  ;;  %v730_v60 = vpack.c.bf16 %v73_v52, %v71_v51  ;;  %v72_v62 = vld [vmem:[#allocation2 + $0xf0] sm:$0xff]  ;;  %v75_v63 = vld [vmem:[#allocation2 + $0x108] sm:$0xff]  ;;  %v818_v2 = vpack.c.bf16 %v161_v59, %v159_v57  ;;  %v158_v3 = vld [vmem:[#allocation2 + $0x3a0] sm:$0xff] }
  0x31   :  { %v160_v4 = vld [vmem:[#allocation2 + $0x3b0] sm:$0xff]  ;;  %v732_v6 = vpack.c.bf16 %v72_v62, %v70_v61  ;;  %v165_v7 = vld [vmem:[#allocation2 + $0x3d8] sm:$0xff]  ;;  %v74_v9 = vld [vmem:[#allocation2 + $0x100] sm:$0xff] }
  0x32   :  { %721 = vmatpush1.bf16.msra.mxu1 %v720_v34  ;;  %v76_v10 = vld [vmem:[#allocation2 + $0x110] sm:$0xff]  ;;  %v79_v11 = vld [vmem:[#allocation2 + $0x128] sm:$0xff]  ;;  %v81_v12 = vld [vmem:[#allocation2 + $0x138] sm:$0xff]  ;;  %v820_v13 = vpack.c.bf16 %v160_v4, %v158_v3 }
  0x33   :  { %797 = vmatpush1.bf16.msra.mxu0 %v796_v0  ;;  %723 = vmatprep.subr.bf16.mxu1 %v722_v36  ;;  %v77_v0 = vld [vmem:[#allocation2 + $0x118] sm:$0xff]  ;;  %v164_v16 = vld [vmem:[#allocation2 + $0x3d0] sm:$0xff]  ;;  %v167_v17 = vld [vmem:[#allocation2 + $0x3e8] sm:$0xff]  ;;  %v738_v20 = vpack.c.bf16 %v81_v12, %v79_v11 }
  0x34   :  { %799 = vmatprep.subr.bf16.mxu0 %v798_v5  ;;  %v163_v5 = vld [vmem:[#allocation2 + $0x3c8] sm:$0xff]  ;;  %v734_v8 = vpack.c.bf16 %v77_v0, %v75_v63  ;;  %v169_v19 = vld [vmem:[#allocation2 + $0x3f8] sm:$0xff]  ;;  %v78_v21 = vld [vmem:[#allocation2 + $0x120] sm:$0xff] }
  0x35   :  { %v822_v14 = vpack.c.bf16 %v165_v7, %v163_v5  ;;  %v80_v22 = vld [vmem:[#allocation2 + $0x130] sm:$0xff]  ;;  %v83_v23 = vld [vmem:[#allocation2 + $0x148] sm:$0xff]  ;;  %v85_v24 = vld [vmem:[#allocation2 + $0x158] sm:$0xff]  ;;  %v826_v26 = vpack.c.bf16 %v169_v19, %v167_v17 }
  0x36   :  { %725 = vmatpush1.bf16.msra.mxu1 %v724_v46  ;;  %v166_v27 = vld [vmem:[#allocation2 + $0x3e0] sm:$0xff]  ;;  %v168_v28 = vld [vmem:[#allocation2 + $0x3f0] sm:$0xff]  ;;  %v173_v31 = vld [vmem:[#allocation2 + $0x418] sm:$0xff]  ;;  %v742_v32 = vpack.c.bf16 %v85_v24, %v83_v23 }
  0x37   :  { %801 = vmatpush1.bf16.msra.mxu0 %v800_v15  ;;  %727 = vmatprep.subr.bf16.mxu1 %v726_v48  ;;  %v162_v15 = vld [vmem:[#allocation2 + $0x3c0] sm:$0xff]  ;;  %v84_v34 = vld [vmem:[#allocation2 + $0x150] sm:$0xff]  ;;  %v87_v35 = vld [vmem:[#allocation2 + $0x168] sm:$0xff]  ;;  %v828_v37 = vpack.c.bf16 %v168_v28, %v166_v27 }
  0x38   :  { %803 = vmatprep.subr.bf16.mxu0 %v802_v18  ;;  %v736_v18 = vpack.c.bf16 %v76_v10, %v74_v9  ;;  %v824_v25 = vpack.c.bf16 %v164_v16, %v162_v15  ;;  %v82_v33 = vld [vmem:[#allocation2 + $0x140] sm:$0xff]  ;;  %v89_v36 = vld [vmem:[#allocation2 + $0x178] sm:$0xff]  ;;  %v172_v40 = vld [vmem:[#allocation2 + $0x410] sm:$0xff] }
  0x39   :  { %v170_v39 = vld [vmem:[#allocation2 + $0x400] sm:$0xff]  ;;  %v177_v43 = vld [vmem:[#allocation2 + $0x438] sm:$0xff]  ;;  %v746_v44 = vpack.c.bf16 %v89_v36, %v87_v35  ;;  %v88_v46 = vld [vmem:[#allocation2 + $0x170] sm:$0xff] }
  0x3a   :  { %729 = vmatpush1.bf16.msra.mxu1 %v728_v58  ;;  %v86_v45 = vld [vmem:[#allocation2 + $0x160] sm:$0xff]  ;;  %v91_v47 = vld [vmem:[#allocation2 + $0x188] sm:$0xff]  ;;  %v93_v48 = vld [vmem:[#allocation2 + $0x198] sm:$0xff]  ;;  %v832_v51 = vpack.c.bf16 %v172_v40, %v170_v39 }
  0x3b   :  { %805 = vmatpush1.bf16.msra.mxu0 %v804_v29  ;;  %731 = vmatprep.subr.bf16.mxu1 %v730_v60  ;;  %v171_v29 = vld [vmem:[#allocation2 + $0x408] sm:$0xff]  ;;  %v37_v50 = vld [vmem:[%s1173_s0 + $0x10] sm:$0xff]  ;;  %v174_v52 = vld [vmem:[#allocation2 + $0x420] sm:$0xff]  ;;  %v748_v57 = vpack.c.bf16 %v88_v46, %v86_v45  ;;  %v750_v58 = vpack.c.bf16 %v93_v48, %v91_v47 }
  0x3c   :  { %807 = vmatprep.subr.bf16.mxu0 %v806_v30  ;;  %v740_v30 = vpack.c.bf16 %v80_v22, %v78_v21  ;;  %v830_v38 = vpack.c.bf16 %v173_v31, %v171_v29  ;;  %v36_v49 = vld [vmem:[%s1173_s0 + $0x8] sm:$0xff]  ;;  %v181_v56 = vld [vmem:[#allocation2 + $0x458] sm:$0xff]  ;;  %v90_v59 = vld [vmem:[#allocation2 + $0x180] sm:$0xff] }
  0x3d   :  { %350 = vmatprep.mubr.f32.mxu1 %v36_v49  ;;  %v179_v55 = vld [vmem:[#allocation2 + $0x448] sm:$0xff]  ;;  %v92_v60 = vld [vmem:[#allocation2 + $0x190] sm:$0xff]  ;;  %v97_v63 = vld [vmem:[#allocation2 + $0x1b8] sm:$0xff] }
  0x3e   :  { %733 = vmatpush1.bf16.msra.mxu1 %v732_v6  ;;  %v40_v61 = vld [vmem:[%s1173_s0 + $0x28] sm:$0xff]  ;;  %v180_v3 = vld [vmem:[#allocation2 + $0x450] sm:$0xff]  ;;  %v752_v5 = vpack.c.bf16 %v92_v60, %v90_v59  ;;  %v185_v6 = vld [vmem:[#allocation2 + $0x478] sm:$0xff] }
  0x3f   :  { %809 = vmatpush1.bf16.msra.mxu0 %v808_v41  ;;  %735 = vmatprep.subr.bf16.mxu1 %v734_v8  ;;  %v175_v41 = vld [vmem:[#allocation2 + $0x428] sm:$0xff]  ;;  %v94_v8 = vld [vmem:[#allocation2 + $0x1a0] sm:$0xff]  ;;  %v96_v9 = vld [vmem:[#allocation2 + $0x1b0] sm:$0xff] }
  0x40   :  { %811 = vmatprep.subr.bf16.mxu0 %v810_v42  ;;  %v744_v42 = vpack.c.bf16 %v84_v34, %v82_v33  ;;  %v95_v62 = vld [vmem:[#allocation2 + $0x1a8] sm:$0xff]  ;;  %v101_v11 = vld [vmem:[#allocation2 + $0x1d8] sm:$0xff]  ;;  %v184_v15 = vld [vmem:[#allocation2 + $0x470] sm:$0xff]  ;;  %v756_v17 = vpack.c.bf16 %v96_v9, %v94_v8 }
  0x41   :  { %v183_v4 = vld [vmem:[#allocation2 + $0x468] sm:$0xff]  ;;  %v754_v7 = vpack.c.bf16 %v97_v63, %v95_v62  ;;  %v100_v21 = vld [vmem:[#allocation2 + $0x1d0] sm:$0xff]  ;;  %v105_v23 = vld [vmem:[#allocation2 + $0x1f8] sm:$0xff] }
  0x42   :  { %737 = vmatpush1.bf16.msra.mxu1 %v736_v18  ;;  %v99_v10 = vld [vmem:[#allocation2 + $0x1c8] sm:$0xff]  ;;  %v189_v18 = vld [vmem:[#allocation2 + $0x498] sm:$0xff]  ;;  %v188_v27 = vld [vmem:[#allocation2 + $0x490] sm:$0xff] }
  0x43   :  { %813 = vmatpush1.bf16.msra.mxu0 %v812_v53  ;;  %739 = vmatprep.subr.bf16.mxu1 %v738_v20  ;;  %v834_v53 = vpack.c.bf16 %v177_v43, %v175_v41  ;;  %v187_v16 = vld [vmem:[#allocation2 + $0x488] sm:$0xff]  ;;  %v758_v19 = vpack.c.bf16 %v101_v11, %v99_v10  ;;  %v98_v20 = vld [vmem:[#allocation2 + $0x1c0] sm:$0xff]  ;;  %v104_v33 = vld [vmem:[#allocation2 + $0x1f0] sm:$0xff] }
  0x44   :  { %815 = vmatprep.subr.bf16.mxu0 %v814_v54  ;;  %v176_v54 = vld [vmem:[#allocation2 + $0x430] sm:$0xff]  ;;  %v103_v22 = vld [vmem:[#allocation2 + $0x1e8] sm:$0xff]  ;;  %v760_v29 = vpack.c.bf16 %v100_v21, %v98_v20  ;;  %v237_v35 = vld [vmem:[#allocation2 + $0x618] sm:$0xff] }
  0x45   :  { %v836_v0 = vpack.c.bf16 %v176_v54, %v174_v52  ;;  %v191_v28 = vld [vmem:[#allocation2 + $0x4a8] sm:$0xff]  ;;  %v762_v31 = vpack.c.bf16 %v105_v23, %v103_v22  ;;  %v192_v39 = vld [vmem:[#allocation2 + $0x4b0] sm:$0xff]  ;;  %v254_v46 = vld [vmem:[%s1176_s3 + $0x80] sm:$0xff] }
  0x46   :  { %741 = vmatpush1.bf16.msra.mxu1 %v740_v30  ;;  %v193_v30 = vld [vmem:[#allocation2 + $0x4b8] sm:$0xff]  ;;  %v235_v34 = vld [vmem:[#allocation2 + $0x608] sm:$0xff]  ;;  %v236_v45 = vld [vmem:[#allocation2 + $0x610] sm:$0xff] }
  0x47   :  { %817 = vmatpush1.bf16.msra.mxu0 %v816_v1  ;;  %743 = vmatprep.subr.bf16.mxu1 %v742_v32  ;;  %v838_v1 = vpack.c.bf16 %v181_v56, %v179_v55  ;;  %v102_v32 = vld [vmem:[#allocation2 + $0x1e0] sm:$0xff]  ;;  %v195_v40 = vld [vmem:[#allocation2 + $0x4c8] sm:$0xff]  ;;  %v894_v43 = vpack.c.bf16 %v237_v35, %v235_v34  ;;  %v201_v55 = vld [vmem:[#allocation2 + $0x4f8] sm:$0xff] }
  0x48   :  { %819 = vmatprep.subr.bf16.mxu0 %v818_v2  ;;  %v178_v2 = vld [vmem:[#allocation2 + $0x440] sm:$0xff]  ;;  %v764_v41 = vpack.c.bf16 %v104_v33, %v102_v32  ;;  %v255_v47 = vld [vmem:[%s1176_s3 + $0x88] sm:$0xff]  ;;  %v256_v59 = vld [vmem:[%s1176_s3 + $0x90] sm:$0xff] }
  0x49   :  { %v840_v12 = vpack.c.bf16 %v180_v3, %v178_v2  ;;  %v194_v49 = vld [vmem:[#allocation2 + $0x4c0] sm:$0xff]  ;;  %v199_v52 = vld [vmem:[#allocation2 + $0x4e8] sm:$0xff]  ;;  %v898_v56 = vpack.c.bf16 %v255_v47, %v254_v46  ;;  %v257_v60 = vld [vmem:[%s1176_s3 + $0x98] sm:$0xff] }
  0x4a   :  { %745 = vmatpush1.bf16.msra.mxu1 %v744_v42  ;;  %v197_v42 = vld [vmem:[#allocation2 + $0x4d8] sm:$0xff]  ;;  %v198_v62 = vld [vmem:[#allocation2 + $0x4e0] sm:$0xff]  ;;  %v858_v63 = vpack.c.bf16 %v201_v55, %v199_v52  ;;  %v41_v2 = vld [vmem:[%s1173_s0 + $0x30] sm:$0xff] }
  0x4b   :  { %821 = vmatpush1.bf16.msra.mxu0 %v820_v13  ;;  %747 = vmatprep.subr.bf16.mxu1 %v746_v44  ;;  %v842_v13 = vpack.c.bf16 %v185_v6, %v183_v4  ;;  %v234_v44 = vld [vmem:[#allocation2 + $0x600] sm:$0xff]  ;;  %v205_v4 = vld [vmem:[#allocation2 + $0x518] sm:$0xff]  ;;  %v902_v6 = vpack.c.bf16 %v257_v60, %v256_v59  ;;  %v259_v10 = vld [vmem:[%s1176_s3 + $0xa8] sm:$0xff] }
  0x4c   :  { %823 = vmatprep.subr.bf16.mxu0 %v822_v14  ;;  %v182_v14 = vld [vmem:[#allocation2 + $0x460] sm:$0xff]  ;;  %v896_v54 = vpack.c.bf16 %v236_v45, %v234_v44  ;;  %v241_v8 = vld [vmem:[%s1176_s3 + $0x18] sm:$0xff]  ;;  %v243_v20 = vld [vmem:[%s1176_s3 + $0x28] sm:$0xff] }
  0x4d   :  { %v844_v24 = vpack.c.bf16 %v184_v15, %v182_v14  ;;  %v258_v9 = vld [vmem:[%s1176_s3 + $0xa0] sm:$0xff]  ;;  %v204_v14 = vld [vmem:[#allocation2 + $0x510] sm:$0xff]  ;;  %v207_v15 = vld [vmem:[#allocation2 + $0x528] sm:$0xff] }
  0x4e   :  { %749 = vmatpush1.bf16.msra.mxu1 %v748_v57  ;;  %v238_v57 = vld [vmem:[%s1176_s3] sm:$0xff]  ;;  %v260_v21 = vld [vmem:[%s1176_s3 + $0xb0] sm:$0xff]  ;;  %v261_v22 = vld [vmem:[%s1176_s3 + $0xb8] sm:$0xff] }
  0x4f   :  { %825 = vmatpush1.bf16.msra.mxu0 %v824_v25  ;;  %751 = vmatprep.subr.bf16.mxu1 %v750_v58  ;;  %v846_v25 = vpack.c.bf16 %v189_v18, %v187_v16  ;;  %v239_v58 = vld [vmem:[%s1176_s3 + $0x8] sm:$0xff]  ;;  %v906_v18 = vpack.c.bf16 %v259_v10, %v258_v9  ;;  %v245_v32 = vld [vmem:[%s1176_s3 + $0x38] sm:$0xff]  ;;  %v262_v33 = vld [vmem:[%s1176_s3 + $0xc0] sm:$0xff] }
  0x50   :  { %827 = vmatprep.subr.bf16.mxu0 %v826_v26  ;;  %v186_v26 = vld [vmem:[#allocation2 + $0x480] sm:$0xff]  ;;  %v900_v3 = vpack.c.bf16 %v239_v58, %v238_v57  ;;  %v263_v34 = vld [vmem:[%s1176_s3 + $0xc8] sm:$0xff]  ;;  %v220_v55 = vld [vmem:[#allocation2 + $0x590] sm:$0xff] }
  0x51   :  { %v848_v36 = vpack.c.bf16 %v188_v27, %v186_v26  ;;  %v208_v26 = vld [vmem:[#allocation2 + $0x530] sm:$0xff]  ;;  %v211_v27 = vld [vmem:[#allocation2 + $0x548] sm:$0xff]  ;;  %v214_v47 = vld [vmem:[#allocation2 + $0x560] sm:$0xff] }
  0x52   :  { %753 = vmatpush1.bf16.msra.mxu1 %v752_v5  ;;  %v994_v5 = vmov 0.0   ;;  %v247_v44 = vld [vmem:[%s1176_s3 + $0x48] sm:$0xff]  ;;  %v225_v57 = vld [vmem:[#allocation2 + $0x5b8] sm:$0xff]  ;;  %v222_v60 = vld [vmem:[#allocation2 + $0x5a0] sm:$0xff] }
  0x53   :  { %829 = vmatpush1.bf16.msra.mxu0 %v828_v37  ;;  %755 = vmatprep.subr.bf16.mxu1 %v754_v7  ;;  %v850_v37 = vpack.c.bf16 %v193_v30, %v191_v28  ;;  %v240_v7 = vld [vmem:[%s1176_s3 + $0x10] sm:$0xff]  ;;  %v910_v30 = vpack.c.bf16 %v261_v22, %v260_v21  ;;  %v250_v21 = vld [vmem:[%s1176_s3 + $0x60] sm:$0xff]  ;;  %v251_v22 = vld [vmem:[%s1176_s3 + $0x68] sm:$0xff] }
  0x54   :  { %831 = vmatprep.subr.bf16.mxu0 %v830_v38  ;;  %v190_v38 = vld [vmem:[#allocation2 + $0x4a0] sm:$0xff]  ;;  %v904_v16 = vpack.c.bf16 %v241_v8, %v240_v7  ;;  %v232_v9 = vld [vmem:[#allocation2 + $0x5f0] sm:$0xff] }
  0x55   :  { %v852_v48 = vpack.c.bf16 %v192_v39, %v190_v38  ;;  %v212_v38 = vld [vmem:[#allocation2 + $0x550] sm:$0xff]  ;;  %v215_v39 = vld [vmem:[#allocation2 + $0x568] sm:$0xff]  ;;  %v230_v8 = vld [vmem:[#allocation2 + $0x5e0] sm:$0xff] }
  0x56   :  { %422 = vmatmul.mubr.f32.vlgmr.msra.gmra.mrb[0].mxu0 %v37_v50  ;;  %757 = vmatpush1.bf16.msra.mxu1 %v756_v17  ;;  %v854_v50 = vpack.c.bf16 %v197_v42, %v195_v40  ;;  %v209_v17 = vld [vmem:[#allocation2 + $0x538] sm:$0xff]  ;;  %v914_v42 = vpack.c.bf16 %v263_v34, %v262_v33  ;;  %v892_v10 = vpack.c.bf16 %v232_v9, %v230_v8  ;;  %v272_v34 = vlaneseq }
  0x57   :  { %833 = vmatpush1.bf16.msra.mxu0 %v832_v51  ;;  %492 = vmatprep.mubr.f32.mxu0 %v40_v61  ;;  %v196_v51 = vld [vmem:[#allocation2 + $0x4d0] sm:$0xff] }
  0x58   :  { %835 = vmatprep.subr.bf16.mxu0 %v834_v53  ;;  %759 = vmatprep.subr.bf16.mxu1 %v758_v19  ;;  %v35_v53 = vld [vmem:[%s1173_s0] sm:$0xff]  ;;  %v856_v61 = vpack.c.bf16 %v196_v51, %v194_v49  ;;  %v221_v51 = vld [vmem:[#allocation2 + $0x598] sm:$0xff] }
  0x59   :  { %v242_v19 = vld [vmem:[%s1176_s3 + $0x20] sm:$0xff] }
  0x5a   :  { %761 = vmatpush1.bf16.msra.mxu1 %v760_v29  ;;  %v908_v28 = vpack.c.bf16 %v243_v20, %v242_v19  ;;  %v213_v29 = vld [vmem:[#allocation2 + $0x558] sm:$0xff]  ;;  %v267_v19 = vld [vmem:[%s1176_s3 + $0xe8] sm:$0xff] }
  0x5b   :  { %837 = vmatpush1.bf16.msra.mxu0 %v836_v0  ;;  %763 = vmatprep.subr.bf16.mxu1 %v762_v31  ;;  %v200_v0 = vld [vmem:[#allocation2 + $0x4f0] sm:$0xff] }
  0x5c   :  { %839 = vmatprep.subr.bf16.mxu0 %v838_v1  ;;  %v203_v1 = vld [vmem:[#allocation2 + $0x508] sm:$0xff]  ;;  %v860_v11 = vpack.c.bf16 %v200_v0, %v198_v62  ;;  %v244_v31 = vld [vmem:[%s1176_s3 + $0x30] sm:$0xff] }
  0x5d   :  { %v912_v40 = vpack.c.bf16 %v245_v32, %v244_v31  ;;  %v227_v62 = vld [vmem:[#allocation2 + $0x5c8] sm:$0xff] }
  0x5e   :  { %765 = vmatpush1.bf16.msra.mxu1 %v764_v41  ;;  %v217_v41 = vld [vmem:[#allocation2 + $0x578] sm:$0xff] }
  0x5f   :  { %841 = vmatpush1.bf16.msra.mxu0 %v840_v12  ;;  %895 = vmatprep.subr.bf16.mxu1 %v894_v43  ;;  %v862_v12 = vpack.c.bf16 %v205_v4, %v203_v1  ;;  %v246_v43 = vld [vmem:[%s1176_s3 + $0x40] sm:$0xff]  ;;  %v874_v46 = vpack.c.bf16 %v217_v41, %v215_v39  ;;  %v231_v4 = vld [vmem:[#allocation2 + $0x5e8] sm:$0xff] }
  0x60   :  { %843 = vmatprep.subr.bf16.mxu0 %v842_v13  ;;  %v202_v13 = vld [vmem:[#allocation2 + $0x500] sm:$0xff]  ;;  %v916_v49 = vpack.c.bf16 %v247_v44, %v246_v43 }
  0x61   :  { %351 = vmatmul.mubr.f32.vlgmr.msra.gmra.mrb[0].mxu1 %v35_v53  ;;  %v864_v23 = vpack.c.bf16 %v204_v14, %v202_v13  ;;  %v265_v13 = vld [vmem:[%s1176_s3 + $0xd8] sm:$0xff] }
  0x62   :  { %897 = vmatpush1.bf16.msra.mxu1 %v896_v54  ;;  %563 = vmatprep.mubr.f32.mxu1 %v994_v5  ;;  %v218_v54 = vld [vmem:[#allocation2 + $0x580] sm:$0xff]  ;;  %v233_v5 = vld [vmem:[#allocation2 + $0x5f8] sm:$0xff] }
  0x63   :  { %845 = vmatpush1.bf16.msra.mxu0 %v844_v24  ;;  %899 = vmatprep.subr.bf16.mxu1 %v898_v56  ;;  %v866_v24 = vpack.c.bf16 %v209_v17, %v207_v15  ;;  %v223_v56 = vld [vmem:[#allocation2 + $0x5a8] sm:$0xff]  ;;  %v880_v58 = vpack.c.bf16 %v220_v55, %v218_v54  ;;  %v890_v7 = vpack.c.bf16 %v233_v5, %v231_v4  ;;  %v248_v15 = vld [vmem:[%s1176_s3 + $0x50] sm:$0xff] }
  0x64   :  { %847 = vmatprep.subr.bf16.mxu0 %v846_v25  ;;  %v206_v25 = vld [vmem:[#allocation2 + $0x520] sm:$0xff]  ;;  %v882_v59 = vpack.c.bf16 %v225_v57, %v223_v56 }
  0x65   :  { %665 = vmatmul.mubr.msk.f32.vlgmr.msra.gmra.mrb[2].mxu1 %vm282_vm0, %v41_v2  ;;  %v868_v35 = vpack.c.bf16 %v208_v26, %v206_v25  ;;  %v226_v2 = vld [vmem:[#allocation2 + $0x5c0] sm:$0xff]  ;;  %v269_v25 = vld [vmem:[%s1176_s3 + $0xf8] sm:$0xff] }
  0x66   :  { %901 = vmatpush3.bf16.msra.mxu1 %v900_v3  ;;  %v228_v3 = vld [vmem:[#allocation2 + $0x5d0] sm:$0xff] }
  0x67   :  { %849 = vmatpush1.bf16.msra.mxu0 %v848_v36  ;;  %903 = vmatprep.subr.bf16.mxu1 %v902_v6  ;;  %v870_v36 = vpack.c.bf16 %v213_v29, %v211_v27  ;;  %v888_v6 = vpack.c.bf16 %v228_v3, %v226_v2  ;;  %v252_v27 = vld [vmem:[%s1176_s3 + $0x70] sm:$0xff] }
  0x68   :  { %851 = vmatprep.subr.bf16.mxu0 %v850_v37  ;;  %v210_v37 = vld [vmem:[#allocation2 + $0x540] sm:$0xff] }
  0x69   :  { %v872_v45 = vpack.c.bf16 %v212_v38, %v210_v37  ;;  %v270_v37 = vld [vmem:[%s1175_s2] sm:$0x3]  ;;  %s995_s2 = smov [#allocation5]  }
  0x6a   :  { %905 = vmatpush3.bf16.msra.mxu1 %v904_v16  ;;  %v249_v16 = vld [vmem:[%s1176_s3 + $0x58] sm:$0xff]  ;;  %s656_s8 = sshll.u32 %s995_s2, 4  ;;  %s657_s8 = int_to_ptr.vmem [resolvable:$true] %s656_s8 }
  0x6b   :  { %853 = vmatpush1.bf16.msra.mxu0 %v852_v48  ;;  %907 = vmatprep.subr.bf16.mxu1 %v906_v18  ;;  %v216_v48 = vld [vmem:[#allocation2 + $0x570] sm:$0xff]  ;;  %v920_v17 = vpack.c.bf16 %v249_v16, %v248_v15  ;;  %v266_v18 = vld [vmem:[%s1176_s3 + $0xe0] sm:$0xff]  ;;  %s965_s9 = scalar_lea.vmem %s657_s8, 128  ;;  %p970_p9 = scmp.lt.s32.totalorder %s657_s8, %s657_s8 }
  0x6c   :  { %855 = vmatprep.subr.bf16.mxu0 %v854_v50  ;;  %v219_v50 = vld [vmem:[#allocation2 + $0x588] sm:$0xff]  ;;  %v876_v52 = vpack.c.bf16 %v216_v48, %v214_v47  ;;  %v922_v20 = vpack.c.bf16 %v267_v19, %v266_v18  ;;  %p966_p8 = scmp.ne.s32.totalorder %s657_s8, %s965_s9  ;;  %p971_p10 = scmp.lt.s32.totalorder %s965_s9, %s965_s9 }
  0x6d   :  { %v878_v53 = vpack.c.bf16 %v221_v51, %v219_v50 }
  0x6e   :  { %909 = vmatpush3.bf16.msra.mxu1 %v908_v28  ;;  %v253_v28 = vld [vmem:[%s1176_s3 + $0x78] sm:$0xff]  ;;  %p972_p11 = por %p971_p10, %p970_p9 }
  0x6f   :  { %857 = vmatpush1.bf16.msra.mxu0 %v856_v61  ;;  %911 = vmatprep.subr.bf16.mxu1 %v910_v30  ;;  %v224_v61 = vld [vmem:[#allocation2 + $0x5b0] sm:$0xff]  ;;  %v928_v29 = vpack.c.bf16 %v253_v28, %v252_v27 }
  0x70   :  { %859 = vmatprep.subr.bf16.mxu0 %v858_v63  ;;  %v229_v63 = vld [vmem:[#allocation2 + $0x5d8] sm:$0xff]  ;;  %v884_v0 = vpack.c.bf16 %v224_v61, %v222_v60  ;;  %p973_p12 = pnand %p972_p11, %p966_p8 }
  0x71   :  { %v886_v1 = vpack.c.bf16 %v229_v63, %v227_v62 }
  0x72   :  { %913 = vmatpush3.bf16.msra.mxu1 %v912_v40 }
  0x73   :  { %861 = vmatpush1.bf16.msra.mxu0 %v860_v11  ;;  %915 = vmatprep.subr.bf16.mxu1 %v914_v42  ;;  %v39_v11 = vld [vmem:[%s1173_s0 + $0x20] sm:$0xff] }
  0x74   :  { %863 = vmatprep.subr.bf16.mxu0 %v862_v12  ;;  %v264_v12 = vld [vmem:[%s1176_s3 + $0xd0] sm:$0xff] }
  0x75   :  { %v918_v14 = vpack.c.bf16 %v265_v13, %v264_v12 }
  0x76   :  { %917 = vmatpush3.bf16.msra.mxu1 %v916_v49 }
  0x77   :  { %865 = vmatpush1.bf16.msra.mxu0 %v864_v23  ;;  %919 = vmatprep.subr.bf16.mxu1 %v918_v14  ;;  %v924_v23 = vpack.c.bf16 %v251_v22, %v250_v21 }
  0x78   :  { %867 = vmatprep.subr.bf16.mxu0 %v866_v24  ;;  %v268_v24 = vld [vmem:[%s1176_s3 + $0xf0] sm:$0xff] }
  0x79   :  { %v926_v26 = vpack.c.bf16 %v269_v25, %v268_v24 }
  0x7a   :  { %921 = vmatpush3.bf16.msra.mxu1 %v920_v17 }
  0x7b   :  { %869 = vmatpush1.bf16.msra.mxu0 %v868_v35  ;;  %923 = vmatprep.subr.bf16.mxu1 %v922_v20  ;;  %v273_v35 = vshrl.u32 %v272_v34, 7 }
  0x7c   :  { %871 = vmatprep.subr.bf16.mxu0 %v870_v36 }
  0x7d   :  { %v274_v36 = vsub.s32 0, %v273_v35  ;;  %v278_v38 = vsub.s32 1, %v273_v35 }
  0x7e   :  { %925 = vmatpush3.bf16.msra.mxu1 %v924_v23 }
  0x7f   :  { %873 = vmatpush1.bf16.msra.mxu0 %v872_v45  ;;  %927 = vmatprep.subr.bf16.mxu1 %v926_v26  ;;  %v275_v39 = vrot.slane %v270_v37, %v274_v36  ;;  %v279_v40 = vrot.slane %v270_v37, %v278_v38 }
  0x80   :  { %875 = vmatprep.subr.bf16.mxu0 %v874_v46 }
  0x82   :  { %929 = vmatpush3.bf16.msra.mxu1 %v928_v29 }
  0x83   :  { %877 = vmatpush1.bf16.msra.mxu0 %v876_v52  ;;  %v666_v52 = vld [vmem:[%s1177_s4] ss:$0 sm:$0xff] }
  0x84   :  { %879 = vmatprep.subr.bf16.mxu0 %v878_v53 }
  0x87   :  { %881 = vmatpush1.bf16.msra.mxu0 %v880_v58 }
  0x88   :  { %883 = vmatprep.subr.bf16.mxu0 %v882_v59 }
  0x8b   :  { %885 = vmatpush1.bf16.msra.mxu0 %v884_v0 }
  0x8c   :  { %887 = vmatprep.subr.bf16.mxu0 %v886_v1 }
  0x8f   :  { %889 = vmatpush1.bf16.msra.mxu0 %v888_v6 }
  0x90   :  { %891 = vmatprep.subr.bf16.mxu0 %v890_v7 }
  0x93   :  { %893 = vmatpush1.bf16.msra.mxu0 %v892_v10 }
  0x96   :  { %493 = vmatmul.mubr.f32.vlgmr.msra.gmra.mrb[0].mxu0 %v39_v11 }
 0x134   :  { %v352_v30 = vpop.f32.mrb[0].mxu1 }
 0x135   :  { %v354_v31 = vpop.f32.mrb[1].mxu1  ;;  %v353_v41 = vadd.f32 %v352_v30, %v275_v39 }
 0x136   :  { %v355_v42 = vadd.f32 %v354_v31, %v279_v40 }
 0x138   :  { %v565_v32 = vpop.f32.mrb[2].mxu1 }
 0x139   :  { %v567_v33 = vpop.f32.mrb[3].mxu1 }
 0x169   :  { %v494_v43 = vpop.f32.mrb[0].mxu0 }
 0x16a   :  { %v931_v44 = vadd.f32 %v494_v43, %v353_v41  ;;  %v496_v45 = vpop.f32.mrb[1].mxu0 }
 0x16b   :  { %v934_v46 = vadd.f32 %v496_v45, %v355_v42 }
 0x16c   :  { %v932_v47 = vadd.f32 %v931_v44, %v565_v32 }
 0x16d   :  { %v935_v48 = vadd.f32 %v934_v46, %v567_v33 }
 0x16e   :  { %v570_v50 = vmax.f32 %v932_v47, 0.0 }
 0x16f   :  { %v571_v49 = vmax.f32 %v935_v48, 0.0 }
 0x171   :  { %643 = vmatprep.mubr.f32.mxu1 %v571_v49 }
 0x172   :  { %644 = vmatmul.mubr.f32.vlgmr.msra.gmra.mrb[4].mxu1 %v570_v50 }
 0x245   :  { %v699_v51 = vpop.f32.mrb[4].mxu1 }
 0x246   :  { %v700_v53 = vpop.f32.mrb[5].mxu1 }
 0x247   :  { %v701_v54 = vadd.f32 %v700_v53, %v699_v51 }
 0x249   :  { %v646_v55 = vadd.f32 %v701_v54, %v666_v52 }
 0x24b   :  { %649 = vst [vmem:[#allocation5] sm:$0xff] %v646_v55 }
 0x24c   :  { %976 = shalt.err (!%p973_p12)
}
 0x24d   :  { %s977_s12 = scalar_lea.hbm %s1178_s5, 128 }
 0x24e   :  { %p978_p13 = scmp.ne.s32.totalorder %s1178_s5, %s977_s12  ;;  %p981_p0 = scmp.lt.u32.totalorder %s977_s12, %s1178_s5 }
 0x250   :  { %p983_p1 = pnand %p981_p0, %p978_p13 }
 0x252   :  { %986 = shalt.err (!%p983_p1)
}
 0x253   :  { %659 = dma.vmem_to_hbm [thread:$0]  %s657_s8, 128, %s1178_s5, [#allocation4]  }
 0x254   :  { %989 = dma.done.wait [#allocation4], 128  }
 0x255   :  { %990 = vsyncadd [#allocation4], 4294967168 }
 0x256   :  { %663 = vsyncpa [#allocation3], 1 }
 0x257   :  { %664 = vsyncpa [#allocation4], 1 }

</bundles_post_ra>
